<compile_context>
chip_gen: v7x
topology: tpu7x:2x2x1
jax: 0.10.0
libtpu: 0.0.40
codegen_flags: <defaults>
</compile_context>

<pallas_src>
import functools

import jax
import jax.numpy as jnp
from jax import lax
from jax.experimental import pallas as pl
from jax.experimental.pallas import tpu as pltpu


def _embed_gather_kernel(ids_ref, w_hbm, out_ref, row_buf, copy_sems, *,
                         tokens_per_tile, vocab):
    """Gather `tokens_per_tile` embedding rows from HBM into the output tile."""
    tile = pl.program_id(0)
    base = tile * tokens_per_tile

    # Issue all row DMAs for this tile (they run concurrently in the DMA engine).
    def _issue(r, carry):
        tok = jnp.clip(ids_ref[base + r], 0, vocab - 1)
        pltpu.make_async_copy(w_hbm.at[tok], row_buf.at[r],
                              copy_sems.at[r]).start()
        return carry

    lax.fori_loop(0, tokens_per_tile, _issue, 0)

    # Wait for all row DMAs of this tile.
    def _wait(r, carry):
        pltpu.make_async_copy(w_hbm.at[0], row_buf.at[r],
                              copy_sems.at[r]).wait()
        return carry

    lax.fori_loop(0, tokens_per_tile, _wait, 0)

    # Hand the gathered tile to the pipelined output block (writeback to HBM
    # is handled by the Pallas pipeline; partial tail blocks are masked).
    out_ref[...] = row_buf[...]


def hidden_parallel_embedding_1d(input_ids, weight, *, tokens_per_tile=128):
    """Forward pass of HiddenParallelEmbedding1D: out = weight[input_ids]."""
    vocab, dim = weight.shape
    ids_flat = input_ids.reshape(-1).astype(jnp.int32)
    n = ids_flat.shape[0]

    # Row-tile size: multiple of 8 (f32 sublane packing) and <= n, unless the
    # whole problem is smaller than one sublane group (then use the full dim).
    if n < 8:
        t = n
    else:
        t = max(8, (min(tokens_per_tile, n) // 8) * 8)

    grid = pl.cdiv(n, t)
    n_ids_pad = grid * t
    if n_ids_pad != n:
        # Only the tiny id vector is padded (clamped in-kernel); the big
        # weight / output tensors are never padded or copied in HBM.
        ids_flat = jnp.pad(ids_flat, (0, n_ids_pad - n))

    kernel = functools.partial(_embed_gather_kernel,
                               tokens_per_tile=t, vocab=vocab)

    out = pl.pallas_call(
        kernel,
        out_shape=jax.ShapeDtypeStruct((n, dim), weight.dtype),
        grid_spec=pltpu.PrefetchScalarGridSpec(
            num_scalar_prefetch=1,                 # token ids -> SMEM
            grid=(grid,),
            in_specs=[pl.BlockSpec(memory_space=pl.ANY)],   # weight stays in HBM
            out_specs=pl.BlockSpec((t, dim), lambda i, ids: (i, 0)),
            scratch_shapes=[
                pltpu.VMEM((t, dim), weight.dtype),          # gathered rows
                pltpu.SemaphoreType.DMA((t,)),               # one sem per row
            ]),
        compiler_params=pltpu.CompilerParams(
            dimension_semantics=("parallel",)),
    )(ids_flat, weight)

    return out.reshape(*input_ids.shape, dim)


def _reference(input_ids, weight):
    return jnp.take(weight, input_ids.reshape(-1), axis=0).reshape(
        *input_ids.shape, weight.shape[-1])


if __name__ == "__main__":
    key = jax.random.PRNGKey(0)
    k_w, k_ids = jax.random.split(key)

    # Small shapes consistent with the module: vocab=512, hidden-per-partition=128,
    # batch=2, seq=8 (tensor_parallel_size = 1).
    num_embeddings, embedding_dim = 512, 128
    B, S = 2, 8

    # init.uniform_(weight, -1, 1) equivalent
    weight = jax.random.uniform(k_w, (num_embeddings, embedding_dim),
                                minval=-1.0, maxval=1.0, dtype=jnp.float32)
    input_ids = jax.random.randint(k_ids, (B, S), 0, num_embeddings,
                                   dtype=jnp.int32)

    out = jax.block_until_ready(hidden_parallel_embedding_1d(input_ids, weight))
    ref = jax.block_until_ready(_reference(input_ids, weight))

    assert out.shape == (B, S, embedding_dim), out.shape
    assert jnp.allclose(out, ref, rtol=0, atol=0), "embedding gather mismatch"
    print("KERNEL_OK")
</pallas_src>

<mosaic_0001>
module attributes {stable_mosaic.version = 11 : i64} {
  func.func @_embed_gather_kernel(%arg0: i32, %arg1: memref<16xi32, #tpu.memory_space<smem>>, %arg2: memref<512x128xf32, #tpu.memory_space<any>>, %arg3: memref<16x128xf32, #tpu.memory_space<vmem>>, %arg4: memref<16x128xf32, #tpu.memory_space<vmem>>, %arg5: memref<16x!tpu.dma_semaphore, #tpu.memory_space<semaphore_mem>>) attributes {dimension_semantics = [#tpu.dimension_semantics<parallel>], iteration_bounds = array<i64: 1>, scalar_prefetch = 1 : i64, scratch_operands = 2 : i64, tpu.core_type = #tpu.core_type<tc>, window_params = [{}, {transform_indices = @transform_1, window_bounds = array<i64: 16, 128>}]} {
    %c16_i32 = arith.constant 16 : i32
    %0 = arith.muli %arg0, %c16_i32 : i32
    %c0_i32 = arith.constant 0 : i32
    %c16_i32_0 = arith.constant 16 : i32
    %1 = arith.addi %c0_i32, %c16_i32_0 : i32
    %c1_i32 = arith.constant 1 : i32
    scf.for %arg6 = %c0_i32 to %1 step %c1_i32  : i32 {
      %5 = arith.addi %0, %arg6 : i32
      %6 = arith.index_cast %5 : i32 to index
      %7 = memref.load %arg1[%6] : memref<16xi32, #tpu.memory_space<smem>>
      %c0_i32_9 = arith.constant 0 : i32
      %c511_i32 = arith.constant 511 : i32
      %8 = arith.maxsi %c0_i32_9, %7 : i32
      %9 = arith.minsi %c511_i32, %8 : i32
      %c0_i32_10 = arith.constant 0 : i32
      %10 = tpu.memref_slice %arg2[%9, %c0_i32_10] : memref<512x128xf32, #tpu.memory_space<any>> -> memref<1x128xf32, #tpu.memory_space<any>>
      %11 = tpu.memref_squeeze %10 : memref<1x128xf32, #tpu.memory_space<any>> -> memref<128xf32, #tpu.memory_space<any>>
      %c0_i32_11 = arith.constant 0 : i32
      %12 = tpu.memref_slice %arg4[%arg6, %c0_i32_11] : memref<16x128xf32, #tpu.memory_space<vmem>> -> memref<1x128xf32, #tpu.memory_space<vmem>>
      %13 = tpu.memref_squeeze %12 : memref<1x128xf32, #tpu.memory_space<vmem>> -> memref<128xf32, #tpu.memory_space<vmem>>
      %14 = tpu.memref_slice %arg5[%arg6] : memref<16x!tpu.dma_semaphore, #tpu.memory_space<semaphore_mem>> -> memref<1x!tpu.dma_semaphore, #tpu.memory_space<semaphore_mem>>
      %15 = tpu.memref_squeeze %14 : memref<1x!tpu.dma_semaphore, #tpu.memory_space<semaphore_mem>> -> memref<!tpu.dma_semaphore, #tpu.memory_space<semaphore_mem>>
      tpu.enqueue_dma source(%11 : memref<128xf32, #tpu.memory_space<any>>) target(%13 : memref<128xf32, #tpu.memory_space<vmem>>) target_semaphore(%15 : memref<!tpu.dma_semaphore, #tpu.memory_space<semaphore_mem>>)
    }
    %c16_i32_1 = arith.constant 16 : i32
    %c0_i32_2 = arith.constant 0 : i32
    %c16_i32_3 = arith.constant 16 : i32
    %2 = arith.addi %c0_i32_2, %c16_i32_3 : i32
    %c1_i32_4 = arith.constant 1 : i32
    scf.for %arg6 = %c0_i32_2 to %2 step %c1_i32_4  : i32 {
      %c0_i32_9 = arith.constant 0 : i32
      %c0_i32_10 = arith.constant 0 : i32
      %5 = tpu.memref_slice %arg2[%c0_i32_9, %c0_i32_10] : memref<512x128xf32, #tpu.memory_space<any>> -> memref<1x128xf32, #tpu.memory_space<any>>
      %6 = tpu.memref_squeeze %5 : memref<1x128xf32, #tpu.memory_space<any>> -> memref<128xf32, #tpu.memory_space<any>>
      %c0_i32_11 = arith.constant 0 : i32
      %7 = tpu.memref_slice %arg4[%arg6, %c0_i32_11] : memref<16x128xf32, #tpu.memory_space<vmem>> -> memref<1x128xf32, #tpu.memory_space<vmem>>
      %8 = tpu.memref_squeeze %7 : memref<1x128xf32, #tpu.memory_space<vmem>> -> memref<128xf32, #tpu.memory_space<vmem>>
      %9 = tpu.memref_slice %arg5[%arg6] : memref<16x!tpu.dma_semaphore, #tpu.memory_space<semaphore_mem>> -> memref<1x!tpu.dma_semaphore, #tpu.memory_space<semaphore_mem>>
      %10 = tpu.memref_squeeze %9 : memref<1x!tpu.dma_semaphore, #tpu.memory_space<semaphore_mem>> -> memref<!tpu.dma_semaphore, #tpu.memory_space<semaphore_mem>>
      tpu.wait_dma2 semaphore(%10 : memref<!tpu.dma_semaphore, #tpu.memory_space<semaphore_mem>>) src(%6 : memref<128xf32, #tpu.memory_space<any>>) dst(%8 : memref<128xf32, #tpu.memory_space<vmem>>)
    }
    %c16_i32_5 = arith.constant 16 : i32
    %c0 = arith.constant 0 : index
    %c0_6 = arith.constant 0 : index
    %3 = vector.load %arg4[%c0, %c0_6] : memref<16x128xf32, #tpu.memory_space<vmem>>, vector<16x128xf32>
    %c0_7 = arith.constant 0 : index
    %c0_8 = arith.constant 0 : index
    %4 = vector.load %arg3[%c0_7, %c0_8] : memref<16x128xf32, #tpu.memory_space<vmem>>, vector<16x128xf32>
    tpu.vector_store %arg3[%c0_7, %c0_8], %3 {strides = array<i32>} : memref<16x128xf32, #tpu.memory_space<vmem>>, vector<16x128xf32>,
    return
  }
  func.func @transform_1(%arg0: i32, %arg1: memref<16xi32, #tpu.memory_space<smem>>) -> (i32, i32) {
    %c0_i32 = arith.constant 0 : i32
    %c0_i32_0 = arith.constant 0 : i32
    return %arg0, %c0_i32 : i32, i32
  }
}

</mosaic_0001>

<bundles_post_ra>
// kernel: tpu_custom_call.1
= control target key start
LH: loop header
LB: loop body
LE: loop exit
PB: predicated region body
PF: predicated region fallthrough
CT: control target
= control target key end

     0   :  { %s381_s0 = inlined_call_operand.hbm [shape: s32[16], index: 0, kind: input, shape index: {}]   ;;  %s382_s1 = inlined_call_operand.hbm [shape: f32[512,128], index: 1, kind: input, shape index: {}]   ;;  %s383_s2 = inlined_call_operand.hbm [shape: f32[16,128], index: 2, kind: output, shape index: {}]  }
   0x1   :  { %s239_s11 = scalar_lea.hbm %s381_s0, 16 }
   0x2   :  { %p240_p0 = scmp.ne.s32.totalorder %s381_s0, %s239_s11  ;;  %p243_p1 = scmp.lt.u32.totalorder %s239_s11, %s381_s0 }
   0x4   :  { %p245_p2 = pnand %p243_p1, %p240_p0 }
   0x6   :  { %248 = shalt.err (!%p245_p2)  }
   0x7   :  { %s317_s16 = smov [#allocation5]  }
   0x8   :  { %8 = dma.hbm_to_smem %s381_s0, 16, %s317_s16, [#allocation4] }
   0x9   :  { %303 = dma.done.wait [#allocation4], 16 }
   0xa   :  { %304 = vsyncadd [#allocation4], 4294967280 }
   0xb   :  { %10 = sfence }
   0xc   :  { %11 = vsyncpa [#allocation7], 0  ;;  %s349_s19 = smov 0  }
   0xd LB: > { %s20_s20 = sld [smem:[#allocation5 + %s311_s19]]  ;;  %s27_s21 = scalar_lea.vmem [#allocation2], %s311_s19  ;;  %s311_s19 = sphi %s349_s19, %s18_s19  }
   0xe   : > { %s36_s22 = sshll.u32 %s27_s21, 4  ;;  %s28_s26 = scalar_lea.sflag [#allocation3], %s311_s19  ;;  %s37_s22 = int_to_ptr.vmem [resolvable:$true] %s36_s22 }
   0xf   : > { %s251_s30 = scalar_lea.hbm %s382_s1, 8192 }
  0x13   : > { %p21_p3 = scmp.gt.s32.totalorder %s20_s20, 0  ;;  %p195_p4 = scmp.lt.s32.totalorder %s20_s20, 511 }
  0x15   : > { %s385_s20 = smov (!%p21_p3, %s20_s20), 0 }
  0x16   : > { %s387_s20 = smov (!%p195_p4, %s385_s20), 511 }
  0x17   : > { %s200_s0 = sshll.u32 %s387_s20, 4 }
  0x18   : > { %s26_s25 = scalar_lea.hbm %s382_s1, %s200_s0 }
  0x19   : > { %s249_s27 = scalar_lea.hbm %s26_s25, 16  ;;  %p252_p6 = scmp.lt.u32.totalorder %s26_s25, %s382_s1 }
  0x1a   : > { %p250_p5 = scmp.ne.s32.totalorder %s26_s25, %s249_s27  ;;  %p253_p7 = scmp.lt.u32.totalorder %s251_s30, %s249_s27 }
  0x1b   : > { %p255_p9 = scmp.lt.u32.totalorder %s249_s27, %s26_s25 }
  0x1c   : > { %p254_p8 = por %p253_p7, %p252_p6 }
  0x1e   : > { %p256_p10 = por %p255_p9, %p254_p8 }
  0x20   : > { %p257_p11 = pnand %p256_p10, %p250_p5 }
  0x22   : > { %260 = shalt.err (!%p257_p11)  }
  0x23   : > { %s261_s5 = scalar_lea.vmem %s37_s22, 16  ;;  %s318_s6 = smov [#allocation2]  }
  0x24   : > { %p262_p12 = scmp.ne.s32.totalorder %s37_s22, %s261_s5  ;;  %s263_s7 = sshll.u32 %s318_s6, 4  ;;  %s264_s7 = int_to_ptr.vmem [resolvable:$false] %s263_s7 }
  0x25   : > { %s265_s8 = scalar_lea.vmem %s264_s7, 256  ;;  %p266_p13 = scmp.lt.s32.totalorder %s37_s22, %s264_s7 }
  0x26   : > { %p267_p0 = scmp.lt.s32.totalorder %s265_s8, %s261_s5 }
  0x28   : > { %p268_p1 = por %p267_p0, %p266_p13 }
  0x2a   : > { %p269_p2 = pnand %p268_p1, %p262_p12 }
  0x2c   : > { %272 = shalt.err (!%p269_p2)  }
  0x2d   : > { %39 = dma.hbm_to_vmem [thread:$0]  %s26_s25, 16, %s37_s22, %s28_s26 }
  0x2e   : > { %s18_s19 = sadd.s32 1, %s311_s19  }
  0x2f   : > { %p15_p3 = scmp.ge.s32.totalorder %s18_s19, 16  }
  0x30   :  { %s313_s9 = smov (%p15_p3), 0  }
  0x31   :  { %17 = sbr.rel (!%p15_p3) target bundleno = 13 (0xd), region = 57 }
  0x38 LB: > { %s46_s10 = scalar_lea.sflag [#allocation3], %s315_s9  ;;  %s315_s9 = sphi %s313_s9, %s45_s9  }
  0x39   : > { %305 = dma.done.wait %s46_s10, 16 }
  0x3a   : > { %306 = vsyncadd %s46_s10, 4294967280  ;;  %s45_s9 = sadd.s32 1, %s315_s9  }
  0x3b   : > { %p42_p4 = scmp.ge.s32.totalorder %s45_s9, 16  }
  0x3c   :  { %v49_v0 = vld [vmem:[#allocation2] sm:$0xff] (%p42_p4)  ;;  %v50_v1 = vld [vmem:[#allocation2 + $0x8] sm:$0xff] (%p42_p4)  ;;  %s319_s11 = smov (%p42_p4), [#allocation6]  }
  0x3d   :  { %44 = sbr.rel (!%p42_p4) target bundleno = 56 (0x38), region = 68  ;;  %51 = vst [vmem:[#allocation6] sm:$0xff] (%p42_p4), %v49_v0  ;;  %52 = vst [vmem:[#allocation6 + $0x8] sm:$0xff] (%p42_p4), %v50_v1  ;;  %s58_s12 = sshll.u32 (%p42_p4), %s319_s11, 4  ;;  %s59_s12 = int_to_ptr.vmem [resolvable:$true] %s58_s12 }
  0x3e   :  { %s273_s13 = scalar_lea.vmem (%p42_p4), %s59_s12, 256  ;;  %p278_p6 = scmp.lt.s32.totalorder (%p42_p4), %s59_s12, %s59_s12 }
  0x3f   :  { %p274_p5 = scmp.ne.s32.totalorder (%p42_p4), %s59_s12, %s273_s13  ;;  %p279_p7 = scmp.lt.s32.totalorder (%p42_p4), %s273_s13, %s273_s13 }
  0x41   :  { %p280_p8 = por (%p42_p4), %p279_p7, %p278_p6 }
  0x43   :  { %p281_p9 = pnand (%p42_p4), %p280_p8, %p274_p5 }
  0x45   :  { %284 = shalt.err (!%p281_p9)
}
  0x46   :  { %s285_s15 = scalar_lea.hbm %s383_s2, 256 }
  0x47   :  { %p286_p10 = scmp.ne.s32.totalorder %s383_s2, %s285_s15  ;;  %p289_p11 = scmp.lt.u32.totalorder %s285_s15, %s383_s2 }
  0x49   :  { %p291_p12 = pnand %p289_p11, %p286_p10 }
  0x4b   :  { %294 = shalt.err (!%p291_p12)
}
  0x4c   :  { %s320_s20 = smov 128   ;;  %s321_s21 = smov 8  }
  0x4d   :  { %64 = dma.vmem_to_hbm [thread:$0]  %s59_s12, 256, %s383_s2, [#allocation7], %s320_s20, %s320_s20, %s321_s21  }
  0x4e   :  { %307 = dma.done.wait [#allocation7], 256  }
  0x4f   :  { %308 = vsyncadd [#allocation7], 4294967040 }
  0x50   :  { %68 = vsyncpa [#allocation7], 1 }
  0x51   :  { %69 = vsyncmov [#allocation3] }
  0x54   :  { %s70_s23 = vpop.sfrf %69 }
  0x55   :  { %p201_p13 = scmp.ne.s32.totalorder %s70_s23, 0 }
  0x57   :  { %74 = shalt.err (%p201_p13)  }
  0x58   :  { %76 = vsyncmov [#allocation3 + $0x1] }
  0x5b   :  { %s77_s24 = vpop.sfrf %76 }
  0x5c   :  { %p202_p0 = scmp.ne.s32.totalorder %s77_s24, 0 }
  0x5e   :  { %81 = shalt.err (%p202_p0)  }
  0x5f   :  { %83 = vsyncmov [#allocation3 + $0x2] }
  0x62   :  { %s84_s25 = vpop.sfrf %83 }
  0x63   :  { %p203_p1 = scmp.ne.s32.totalorder %s84_s25, 0 }
  0x65   :  { %88 = shalt.err (%p203_p1)  }
  0x66   :  { %90 = vsyncmov [#allocation3 + $0x3] }
  0x69   :  { %s91_s26 = vpop.sfrf %90 }
  0x6a   :  { %p204_p2 = scmp.ne.s32.totalorder %s91_s26, 0 }
  0x6c   :  { %95 = shalt.err (%p204_p2)  }
  0x6d   :  { %97 = vsyncmov [#allocation3 + $0x4] }
  0x70   :  { %s98_s2 = vpop.sfrf %97 }
  0x71   :  { %p205_p3 = scmp.ne.s32.totalorder %s98_s2, 0 }
  0x73   :  { %102 = shalt.err (%p205_p3)  }
  0x74   :  { %104 = vsyncmov [#allocation3 + $0x5] }
  0x77   :  { %s105_s27 = vpop.sfrf %104 }
  0x78   :  { %p206_p4 = scmp.ne.s32.totalorder %s105_s27, 0 }
  0x7a   :  { %109 = shalt.err (%p206_p4)  }
  0x7b   :  { %111 = vsyncmov [#allocation3 + $0x6] }
  0x7e   :  { %s112_s28 = vpop.sfrf %111 }
  0x7f   :  { %p207_p5 = scmp.ne.s32.totalorder %s112_s28, 0 }
  0x81   :  { %116 = shalt.err (%p207_p5)  }
  0x82   :  { %118 = vsyncmov [#allocation3 + $0x7] }
  0x85   :  { %s119_s29 = vpop.sfrf %118 }
  0x86   :  { %p208_p6 = scmp.ne.s32.totalorder %s119_s29, 0 }
  0x88   :  { %123 = shalt.err (%p208_p6)  }
  0x89   :  { %125 = vsyncmov [#allocation3 + $0x8] }
  0x8c   :  { %s126_s30 = vpop.sfrf %125 }
  0x8d   :  { %p209_p7 = scmp.ne.s32.totalorder %s126_s30, 0 }
  0x8f   :  { %130 = shalt.err (%p209_p7)  }
  0x90   :  { %132 = vsyncmov [#allocation3 + $0x9] }
  0x93   :  { %s133_s3 = vpop.sfrf %132 }
  0x94   :  { %p210_p8 = scmp.ne.s32.totalorder %s133_s3, 0 }
  0x96   :  { %137 = shalt.err (%p210_p8)  }
  0x97   :  { %139 = vsyncmov [#allocation3 + $0xa] }
  0x9a   :  { %s140_s4 = vpop.sfrf %139 }
  0x9b   :  { %p211_p9 = scmp.ne.s32.totalorder %s140_s4, 0 }
  0x9d   :  { %144 = shalt.err (%p211_p9)  }
  0x9e   :  { %146 = vsyncmov [#allocation3 + $0xb] }
  0xa1   :  { %s147_s5 = vpop.sfrf %146 }
  0xa2   :  { %p212_p10 = scmp.ne.s32.totalorder %s147_s5, 0 }
  0xa4   :  { %151 = shalt.err (%p212_p10)  }
  0xa5   :  { %153 = vsyncmov [#allocation3 + $0xc] }
  0xa8   :  { %s154_s6 = vpop.sfrf %153 }
  0xa9   :  { %p213_p11 = scmp.ne.s32.totalorder %s154_s6, 0 }
  0xab   :  { %158 = shalt.err (%p213_p11)  }
  0xac   :  { %160 = vsyncmov [#allocation3 + $0xd] }
  0xaf   :  { %s161_s7 = vpop.sfrf %160 }
  0xb0   :  { %p214_p12 = scmp.ne.s32.totalorder %s161_s7, 0 }
  0xb2   :  { %165 = shalt.err (%p214_p12)  }
  0xb3   :  { %167 = vsyncmov [#allocation3 + $0xe] }
  0xb6   :  { %s168_s8 = vpop.sfrf %167 }
  0xb7   :  { %p215_p13 = scmp.ne.s32.totalorder %s168_s8, 0 }
  0xb9   :  { %172 = shalt.err (%p215_p13)  }
  0xba   :  { %174 = vsyncmov [#allocation3 + $0xf] }
  0xbd   :  { %s175_s9 = vpop.sfrf %174 }
  0xbe   :  { %p216_p0 = scmp.ne.s32.totalorder %s175_s9, 0 }
  0xc0   :  { %179 = shalt.err (%p216_p0)  }

</bundles_post_ra>
